<compile_context>
chip_gen: v7x
topology: tpu7x:2x2x1
jax: 0.10.0
libtpu: 0.0.40
codegen_flags: <defaults>
</compile_context>

<pallas_src>
import functools
import math

import jax
import jax.numpy as jnp
from jax.experimental import pallas as pl
from jax.experimental.pallas import tpu as pltpu


_VMEM_LIMIT = 32 * 1024 * 1024   # scoped VMEM limit (safe on v5e/v6e/v7x)
_BLOCK_BYTES = 8 * 1024 * 1024   # target input bytes per block (x2 double-buffered)
_ACC_BYTES = 2 * 1024 * 1024     # cap on the per-block (TM,128) val/idx accumulators
_LANE = 128                      # lane width / inner chunk size
_MAX_UNROLL_C = 64               # channel path unrolls the channel loop up to this


def _pick_tile(total: int, unit: int, cap: int) -> int:
    """Largest multiple of `unit` that divides `total` and is <= cap.

    Falls back to `total` (a full-extent block, always legal) when no such
    divisor exists (e.g. `total` is not a multiple of `unit`).
    """
    if total <= unit:
        return total
    t = (min(total, max(cap, unit)) // unit) * unit
    while t >= unit:
        if total % t == 0:
            return t
        t -= unit
    return total


# ----------------------------------------------------------------------------
# Path A: argmax over a non-last ("channel") axis -- sublane reduce, no
# transpose, dense (TP, TL) int32 output blocks.
# ----------------------------------------------------------------------------
def _argmax_channel_kernel(x_ref, o_ref, *, check_nan):
    """Argmax over axis 1 of a (TP, C, TL) block -> (TP, TL) int32.

    Running (value, index) pair reduction over the (small, unrolled) channel
    axis: no full-tile iota / candidate temporaries; first-max / first-NaN
    (torch) semantics are folded into the `take` predicate.
    """
    c = x_ref.shape[1]
    bv = x_ref[:, 0, :]                                   # (TP, TL)
    bi = jnp.zeros(bv.shape, jnp.int32)
    for ci in range(1, c):
        v = x_ref[:, ci, :]
        if check_nan:
            take = jnp.logical_or(
                v > bv,
                jnp.logical_and(jnp.isnan(v), jnp.logical_not(jnp.isnan(bv))))
        else:
            take = v > bv
        bv = jnp.where(take, v, bv)
        bi = jnp.where(take, jnp.int32(ci), bi)
    o_ref[...] = bi


def _argmax_middle_axis(x3d: jax.Array) -> jax.Array:
    """Argmax over axis 1 of (P, C, L) -> (P, L) int32. No transpose, no cast."""
    p, c, l = x3d.shape
    dtype = x3d.dtype
    itemsize = dtype.itemsize
    check_nan = bool(jnp.issubdtype(dtype, jnp.floating))
    c_eff = -(-c // 8) * 8          # channel axis is sublane-padded in VMEM
    p_orig, l_orig = p, l

    # Keep lane blocks 128-aligned unless the whole lane extent is small.
    if l % _LANE != 0 and c_eff * l * itemsize > _BLOCK_BYTES:
        padl = (-l) % _LANE
        x3d = jnp.pad(x3d, ((0, 0), (0, 0), (0, padl)))
        l += padl
    # Prefix (row) blocks must be 8-aligned or full-extent; pad rows only when
    # a full-extent row block would blow the budget.
    if p % 8 != 0 and p * c_eff * min(l, _LANE) * itemsize > _BLOCK_BYTES:
        padp = (-p) % 8
        x3d = jnp.pad(x3d, ((0, padp), (0, 0), (0, 0)))
        p += padp

    row_unit = 8 if (p % 8 == 0 and p >= 8) else p
    cap_l = max(_LANE, _BLOCK_BYTES // max(1, c_eff * itemsize * max(1, row_unit)))
    tl = _pick_tile(l, _LANE, cap_l)
    if row_unit >= p:
        tp = p
    else:
        cap_p = max(row_unit, _BLOCK_BYTES // max(1, c_eff * tl * itemsize))
        tp = _pick_tile(p, row_unit, cap_p)

    # Give megacore (v7x: 2 TensorCores) at least two parallel blocks.
    if (p // tp) * (l // tl) < 2:
        if l % _LANE == 0 and l // _LANE >= 2:
            tl = _pick_tile(l, _LANE, max(_LANE, tl // 2))
        elif row_unit < p and p >= 2 * row_unit:
            tp = _pick_tile(p, row_unit, max(row_unit, tp // 2))

    grid = (p // tp, l // tl)
    out = pl.pallas_call(
        functools.partial(_argmax_channel_kernel, check_nan=check_nan),
        out_shape=jax.ShapeDtypeStruct((p, l), jnp.int32),
        grid_spec=pltpu.PrefetchScalarGridSpec(
            num_scalar_prefetch=0,
            grid=grid,
            in_specs=[pl.BlockSpec((tp, c, tl), lambda i, j: (i, 0, j))],
            out_specs=pl.BlockSpec((tp, tl), lambda i, j: (i, j)),
        ),
        compiler_params=pltpu.CompilerParams(
            dimension_semantics=("parallel", "parallel"),
            vmem_limit_bytes=_VMEM_LIMIT,
        ),
    )(x3d)
    if (p, l) != (p_orig, l_orig):
        out = out[:p_orig, :l_orig]
    return out


# ----------------------------------------------------------------------------
# Path B: argmax over the last (lane) axis of a 2-D (M, K) view. K is tiled on
# an "arbitrary" grid axis; the output refs are the running accumulators.
# ----------------------------------------------------------------------------
def _argmax_lane_kernel(x_ref, idx_ref, max_ref, *, check_nan, init_val):
    """Running row argmax over the lane axis of a (TM, TK) block.

    idx_ref (TM,1) int32 / max_ref (TM,1) are resident across the K grid axis
    and act as the cross-tile accumulators. Inside the block a (TM,128)
    (value, index) pair reduction over 128-lane chunks avoids any full-tile
    int32 temporaries; a single cross-lane combine finishes the tile.
    """
    kk = pl.program_id(1)

    @pl.when(kk == 0)
    def _init():
        idx_ref[...] = jnp.zeros(idx_ref.shape, jnp.int32)
        max_ref[...] = jnp.full(max_ref.shape, init_val, max_ref.dtype)

    tm, tk = x_ref.shape
    n_chunks = tk // _LANE           # wrapper guarantees tk % 128 == 0
    lane = jax.lax.broadcasted_iota(jnp.int32, (tm, _LANE), 1)  # hoisted once

    bv = x_ref[:, :_LANE]            # chunk 0 seeds the pair accumulators
    bi = lane

    def chunk_body(ci, carry):
        bv, bi = carry
        off = pl.multiple_of(ci * _LANE, _LANE)
        v = x_ref[:, pl.ds(off, _LANE)]
        if check_nan:
            take = jnp.logical_or(
                v > bv,
                jnp.logical_and(jnp.isnan(v), jnp.logical_not(jnp.isnan(bv))))
        else:
            take = v > bv
        bv = jnp.where(take, v, bv)
        bi = jnp.where(take, lane + ci * _LANE, bi)
        return bv, bi

    if n_chunks > 1:
        bv, bi = jax.lax.fori_loop(1, n_chunks, chunk_body, (bv, bi))

    # Cross-lane combine: (NaN-aware) max value and its first index in the tile.
    big = jnp.int32(tk)
    if check_nan:
        nan_mask = jnp.isnan(bv)
        has_nan = jnp.any(nan_mask, axis=-1, keepdims=True)
        bv_f = jnp.where(nan_mask, jnp.asarray(-jnp.inf, dtype=bv.dtype), bv)
        tile_max = jnp.max(bv_f, axis=-1, keepdims=True)
        idx_max = jnp.min(jnp.where(bv_f == tile_max, bi, big),
                          axis=-1, keepdims=True)
        idx_nan = jnp.min(jnp.where(nan_mask, bi, big), axis=-1, keepdims=True)
        tile_val = jnp.where(has_nan, jnp.full_like(tile_max, jnp.nan), tile_max)
        tile_idx = jnp.where(has_nan, idx_nan, idx_max)
    else:
        tile_val = jnp.max(bv, axis=-1, keepdims=True)
        tile_idx = jnp.min(jnp.where(bv == tile_val, bi, big),
                           axis=-1, keepdims=True)

    # Merge into the running cross-tile accumulators. Strict > keeps the
    # earliest tile on ties; a recorded NaN is never displaced.
    run_max = max_ref[...]
    if check_nan:
        take = jnp.logical_and(
            jnp.logical_not(jnp.isnan(run_max)),
            jnp.logical_or(jnp.isnan(tile_val), tile_val > run_max))
    else:
        take = tile_val > run_max
    max_ref[...] = jnp.where(take, tile_val, run_max)
    idx_ref[...] = jnp.where(take, tile_idx + kk * tk, idx_ref[...])


def _argmax_last_axis(x2d: jax.Array):
    """Row argmax over the last axis of (M, K) -> (idx (M,) int32, rowmax (M,))."""
    m, k = x2d.shape
    dtype = x2d.dtype
    itemsize = dtype.itemsize
    check_nan = bool(jnp.issubdtype(dtype, jnp.floating))
    init_val = float("-inf") if check_nan else int(jnp.iinfo(dtype).min)
    m_orig = m

    # The in-kernel chunk loop needs 128-aligned lane tiles: pad K once with
    # the identity value (can never displace a real first-max / first-NaN).
    if k % _LANE != 0:
        padk = (-k) % _LANE
        x2d = jnp.pad(x2d, ((0, 0), (0, padk)), constant_values=init_val)
        k += padk

    tk = _pick_tile(k, _LANE, max(_LANE, _BLOCK_BYTES // (8 * itemsize)))
    cap_m = max(8, min(_BLOCK_BYTES // (tk * itemsize),
                       _ACC_BYTES // (_LANE * (itemsize + 4))))

    # Row blocks must be 8-aligned or full-extent; pad rows only when a
    # full-extent row block would blow the VMEM budget.
    if m % 8 != 0 and m * tk * itemsize > _BLOCK_BYTES:
        padm = (-m) % 8
        x2d = jnp.pad(x2d, ((0, padm), (0, 0)), constant_values=init_val)
        m += padm
    if m % 8 == 0 and m >= 8:
        tm = _pick_tile(m, 8, cap_m)
        if m // tm < 2 and m >= 16:          # 2+ row blocks for megacore (v7x)
            tm = _pick_tile(m, 8, max(8, tm // 2))
    else:
        tm = m

    grid = (m // tm, k // tk)
    kernel = functools.partial(_argmax_lane_kernel,
                               check_nan=check_nan, init_val=init_val)
    idx, rowmax = pl.pallas_call(
        kernel,
        out_shape=(jax.ShapeDtypeStruct((m, 1), jnp.int32),
                   jax.ShapeDtypeStruct((m, 1), dtype)),
        grid_spec=pltpu.PrefetchScalarGridSpec(
            num_scalar_prefetch=0,
            grid=grid,
            in_specs=[pl.BlockSpec((tm, tk), lambda i, j: (i, j))],
            out_specs=[pl.BlockSpec((tm, 1), lambda i, j: (i, 0)),
                       pl.BlockSpec((tm, 1), lambda i, j: (i, 0))],
        ),
        compiler_params=pltpu.CompilerParams(
            dimension_semantics=("parallel", "arbitrary"),
            vmem_limit_bytes=_VMEM_LIMIT,
        ),
    )(x2d)
    return idx[:m_orig, 0], rowmax[:m_orig, 0]


# ----------------------------------------------------------------------------
# Public wrapper: Pallas equivalent of ArgMax(dim).forward(x).
# ----------------------------------------------------------------------------
def argmax(x: jax.Array, dim=None) -> jax.Array:
    """torch.argmax(x, dim) with int32 indices; first-max / first-NaN ties."""
    x = jnp.asarray(x)
    if x.dtype == jnp.bool_:
        x = x.astype(jnp.int32)

    if dim is None:
        t = x.size
        itemsize = x.dtype.itemsize
        # Row-major chunks preserve torch's flat first-tie / first-NaN order;
        # keep >=2 rows when possible so both v7x TensorCores get work.
        cap = min(max(_LANE, t // 2), max(_LANE, _BLOCK_BYTES // (8 * itemsize)))
        k = _pick_tile(t, _LANE, cap)
        idx, rowmax = _argmax_last_axis(x.reshape(t // k, k))
        r = jnp.argmax(rowmax)               # tiny cross-row combine (glue JAX)
        return (r.astype(jnp.int32) * jnp.int32(k) + idx[r]).astype(jnp.int32)

    ndim = x.ndim
    dim = dim % ndim
    shape = x.shape
    kept_shape = shape[:dim] + shape[dim + 1:]

    if dim == ndim - 1:
        # Reduced axis is already the contiguous lane axis.
        idx, _ = _argmax_last_axis(x.reshape(-1, shape[-1]))
        return idx.reshape(kept_shape)

    p = math.prod(shape[:dim])
    c = shape[dim]
    l = math.prod(shape[dim + 1:])

    if l == 1:
        # Reduced axis is effectively the last non-trivial axis.
        idx, _ = _argmax_last_axis(x.reshape(p, c))
        return idx.reshape(kept_shape)

    if c <= _MAX_UNROLL_C:
        # Main UNet path (dim=1 on NCHW): reduce over the channel/sublane axis
        # in place -- no transpose, no dtype cast.
        return _argmax_middle_axis(x.reshape(p, c, l)).reshape(kept_shape)

    # TODO(synk): very large reduced (channel) axes fall back to an HBM
    # transpose; a sublane-tiled accumulator kernel would avoid the extra copy.
    perm = tuple(i for i in range(ndim) if i != dim) + (dim,)
    idx, _ = _argmax_last_axis(jnp.transpose(x, perm).reshape(-1, c))
    return idx.reshape(kept_shape)


if __name__ == "__main__":
    key = jax.random.PRNGKey(0)
    # Small NCHW input, as the surrounding UNet would feed (logits over classes).
    N, C, H, W = 2, 4, 16, 16
    x = jax.random.normal(key, (N, C, H, W), dtype=jnp.float32)

    # dim=1 (class/channel argmax), the typical use inside the UNet head.
    y = jax.block_until_ready(argmax(x, dim=1))
    assert y.shape == (N, H, W), y.shape
    assert bool(jnp.all(y == jnp.argmax(x, axis=1).astype(jnp.int32))), "dim=1 mismatch"

    # dim=None (flattened argmax), the module's default.
    y_flat = jax.block_until_ready(argmax(x, dim=None))
    assert y_flat.shape == (), y_flat.shape
    assert int(y_flat) == int(jnp.argmax(x)), "flat argmax mismatch"

    # Last-axis path (lane argmax with in-kernel chunked pair reduction).
    y_last = jax.block_until_ready(argmax(x, dim=-1))
    assert bool(jnp.all(y_last == jnp.argmax(x, axis=-1).astype(jnp.int32))), "dim=-1 mismatch"

    # Native-dtype (bf16) channel argmax -- no f32 upcast anywhere.
    x_bf = x.astype(jnp.bfloat16)
    y_bf = jax.block_until_ready(argmax(x_bf, dim=1))
    assert bool(jnp.all(y_bf == jnp.argmax(x_bf, axis=1).astype(jnp.int32))), "bf16 mismatch"

    # torch NaN rule: the first NaN wins.
    x_nan = jax.random.normal(key, (8, 64), dtype=jnp.float32)
    x_nan = x_nan.at[3, 5].set(jnp.nan)
    y_nan = jax.block_until_ready(argmax(x_nan, dim=1))
    ref_nan = jnp.argmax(x_nan, axis=1).astype(jnp.int32)
    assert int(y_nan[3]) == 5, "NaN-first mismatch"
    assert bool(jnp.all(jnp.where(jnp.arange(8) == 3, True, y_nan == ref_nan))), \
        "NaN rows mismatch"

    print("KERNEL_OK")
</pallas_src>

<mosaic_0001>
module attributes {stable_mosaic.version = 11 : i64} {
  func.func @_argmax_channel_kernel(%arg0: i32, %arg1: i32, %arg2: memref<2x4x128xf32, #tpu.memory_space<vmem>>, %arg3: memref<2x128xi32, #tpu.memory_space<vmem>>) attributes {dimension_semantics = [#tpu.dimension_semantics<parallel>, #tpu.dimension_semantics<parallel>], iteration_bounds = array<i64: 1, 2>, scalar_prefetch = 0 : i64, scratch_operands = 0 : i64, tpu.core_type = #tpu.core_type<tc>, window_params = [{transform_indices = @transform_0, window_bounds = array<i64: 2, 4, 128>}, {transform_indices = @transform_1, window_bounds = array<i64: 2, 128>}]} {
    %c0 = arith.constant 0 : index
    %c0_0 = arith.constant 0 : index
    %c0_1 = arith.constant 0 : index
    %0 = vector.load %arg2[%c0, %c0_0, %c0_1] : memref<2x4x128xf32, #tpu.memory_space<vmem>>, vector<2x1x128xf32>
    %1 = vector.shape_cast %0 : vector<2x1x128xf32> to vector<2x128xf32>
    %c0_i32 = arith.constant 0 : i32
    %2 = vector.broadcast %c0_i32 : i32 to vector<2x128xi32>
    %c0_2 = arith.constant 0 : index
    %c1 = arith.constant 1 : index
    %c0_3 = arith.constant 0 : index
    %3 = vector.load %arg2[%c0_2, %c1, %c0_3] : memref<2x4x128xf32, #tpu.memory_space<vmem>>, vector<2x1x128xf32>
    %4 = vector.shape_cast %3 : vector<2x1x128xf32> to vector<2x128xf32>
    %5 = arith.cmpf ogt, %4, %1 : vector<2x128xf32>
    %6 = arith.cmpf one, %4, %4 : vector<2x128xf32>
    %7 = arith.cmpf one, %1, %1 : vector<2x128xf32>
    %cst = arith.constant dense<true> : vector<2x128xi1>
    %8 = arith.xori %7, %cst : vector<2x128xi1>
    %9 = arith.andi %6, %8 : vector<2x128xi1>
    %10 = arith.ori %5, %9 : vector<2x128xi1>
    %11 = arith.select %10, %4, %1 : vector<2x128xi1>, vector<2x128xf32>
    %c1_i32 = arith.constant 1 : i32
    %12 = vector.broadcast %c1_i32 : i32 to vector<2x128xi32>
    %13 = arith.select %10, %12, %2 : vector<2x128xi1>, vector<2x128xi32>
    %c0_4 = arith.constant 0 : index
    %c2 = arith.constant 2 : index
    %c0_5 = arith.constant 0 : index
    %14 = vector.load %arg2[%c0_4, %c2, %c0_5] : memref<2x4x128xf32, #tpu.memory_space<vmem>>, vector<2x1x128xf32>
    %15 = vector.shape_cast %14 : vector<2x1x128xf32> to vector<2x128xf32>
    %16 = arith.cmpf ogt, %15, %11 : vector<2x128xf32>
    %17 = arith.cmpf one, %15, %15 : vector<2x128xf32>
    %18 = arith.cmpf one, %11, %11 : vector<2x128xf32>
    %cst_6 = arith.constant dense<true> : vector<2x128xi1>
    %19 = arith.xori %18, %cst_6 : vector<2x128xi1>
    %20 = arith.andi %17, %19 : vector<2x128xi1>
    %21 = arith.ori %16, %20 : vector<2x128xi1>
    %22 = arith.select %21, %15, %11 : vector<2x128xi1>, vector<2x128xf32>
    %c2_i32 = arith.constant 2 : i32
    %23 = vector.broadcast %c2_i32 : i32 to vector<2x128xi32>
    %24 = arith.select %21, %23, %13 : vector<2x128xi1>, vector<2x128xi32>
    %c0_7 = arith.constant 0 : index
    %c3 = arith.constant 3 : index
    %c0_8 = arith.constant 0 : index
    %25 = vector.load %arg2[%c0_7, %c3, %c0_8] : memref<2x4x128xf32, #tpu.memory_space<vmem>>, vector<2x1x128xf32>
    %26 = vector.shape_cast %25 : vector<2x1x128xf32> to vector<2x128xf32>
    %27 = arith.cmpf ogt, %26, %22 : vector<2x128xf32>
    %28 = arith.cmpf one, %26, %26 : vector<2x128xf32>
    %29 = arith.cmpf one, %22, %22 : vector<2x128xf32>
    %cst_9 = arith.constant dense<true> : vector<2x128xi1>
    %30 = arith.xori %29, %cst_9 : vector<2x128xi1>
    %31 = arith.andi %28, %30 : vector<2x128xi1>
    %32 = arith.ori %27, %31 : vector<2x128xi1>
    %c3_i32 = arith.constant 3 : i32
    %33 = vector.broadcast %c3_i32 : i32 to vector<2x128xi32>
    %34 = arith.select %32, %33, %24 : vector<2x128xi1>, vector<2x128xi32>
    %c0_10 = arith.constant 0 : index
    %c0_11 = arith.constant 0 : index
    %35 = vector.load %arg3[%c0_10, %c0_11] : memref<2x128xi32, #tpu.memory_space<vmem>>, vector<2x128xi32>
    tpu.vector_store %arg3[%c0_10, %c0_11], %34 {strides = array<i32>} : memref<2x128xi32, #tpu.memory_space<vmem>>, vector<2x128xi32>,
    return
  }
  func.func @transform_0(%arg0: i32, %arg1: i32) -> (i32, i32, i32) {
    %c0_i32 = arith.constant 0 : i32
    %c0_i32_0 = arith.constant 0 : i32
    return %arg0, %c0_i32, %arg1 : i32, i32, i32
  }
  func.func @transform_1(%arg0: i32, %arg1: i32) -> (i32, i32) {
    %c0_i32 = arith.constant 0 : i32
    return %arg0, %arg1 : i32, i32
  }
}

</mosaic_0001>

<bundles_post_ra>
// kernel: tpu_custom_call.1
= control target key start
LH: loop header
LB: loop body
LE: loop exit
PB: predicated region body
PF: predicated region fallthrough
CT: control target
= control target key end

     0   :  { %6 = vsyncpa [#allocation3], 0  ;;  %s741_s0 = inlined_call_operand.hbm [shape: f32[2,4,256], index: 0, kind: input, shape index: {}]   ;;  %s742_s1 = inlined_call_operand.hbm [shape: s32[2,256], index: 1, kind: output, shape index: {}]  }
   0x1   :  { %8 = vsyncpa [#allocation3 + $0x1], 0 }
   0x2   :  { %9 = vsyncpa [#allocation4], 0 }
   0x3   :  { %11 = vsyncpa [#allocation4 + $0x1], 0  ;;  %s521_s6 = smov 0   ;;  %s523_s7 = smov 0  }
   0x4   :  { %s525_s8 = smov 0   ;;  %s527_s9 = smov 0  }
   0x5   :  { %s529_s10 = smov 0   ;;  %s531_s11 = smov 0  }
   0x6 LB: > { %s310_s12 = sadd.s32 4294967295, %s502_s11   ;;  %s311_s13 = sadd.s32 4294967294, %s502_s11   ;;  %s502_s11 = sphi %s531_s11, %s17_s11   ;;  %s498_s10 = sphi %s529_s10, %s764_s10   ;;  %s494_s9 = sphi %s527_s9, %s763_s9   ;;  %s490_s8 = sphi %s525_s8, %s762_s8   ;;  %s486_s7 = sphi %s523_s7, %s761_s7   ;;  %s482_s6 = sphi %s521_s6, %s760_s6  }
   0x7   : > { %s26_s14 = sadd.s32 1, %s498_s10  ;;  %s38_s15 = sadd.s32 1, %s490_s8 }
   0x8   : > { %p27_p0 = scmp.ge.s32.totalorder %s26_s14, 2  ;;  %p45_p1 = scmp.ne.s32.totalorder %s490_s8, %s486_s7 }
   0x9   : > { %p46_p2 = scmp.eq.s32.totalorder %s502_s11, 0  ;;  %p51_p3 = scmp.ne.s32.totalorder %s486_s7, %s482_s6 }
   0xa   : > { %s766_s14 = smov (%p27_p0, %s26_s14), 0  ;;  %p52_p5 = scmp.eq.s32.totalorder %s310_s12, 0 }
   0xb   : > { %p562_p4 = por %p46_p2, %p45_p1  ;;  %s34_s17 = ssub.s32 %s498_s10, %s766_s14 }
   0xc   : > { %p77_p6 = scmp.eq.s32.totalorder %s310_s12, 1  ;;  %p36_p7 = scmp.eq.s32.totalorder %s34_s17, 0 }
   0xd   : > { %p568_p8 = por %p52_p5, %p51_p3  ;;  %p83_p10 = scmp.eq.s32.totalorder %s311_s13, 1 }
   0xe   : > { %p572_p9 = por %p77_p6, %p45_p1  ;;  %p335_p13 = scmp.lt.s32.totalorder %s502_s11, 2 }
   0xf   : > { %s577_s20 = scalar_select %p36_p7, %s490_s8, %s38_s15  }
  0x10   : > { %s746_s19 = scalar_select %p572_p9, 1, 0 }
  0x11   : > { %p579_p11 = por %p83_p10, %p51_p3  ;;  %s103_s22 = sand.u32 1, %s490_s8  }
  0x12   : > { %s314_s23 = sshll.u32 %s103_s22, 3  ;;  %s315_s24 = sshll.u32 %s498_s10, 6 }
  0x13   : > { %s747_s21 = scalar_select %p579_p11, 1, 0 }
  0x14   : > { %s590_s27 = scalar_lea.hbm %s741_s0, %s315_s24  ;;  %s107_s28 = scalar_lea.vmem [#allocation2], %s314_s23 }
  0x15   : > { %s116_s29 = sshll.u32 %s107_s28, 4  ;;  %p596_p0 = pnand %p335_p13, %p562_p4  ;;  %s592_s29 = int_to_ptr.vmem [resolvable:$true] %s116_s29 }
  0x16   : > { %s600_s2 = scalar_lea.sflag [#allocation3], %s103_s22  ;;  %s390_s3 = scalar_lea.hbm %s590_s27, 128 }
  0x17   : > { %p391_p1 = scmp.ne.s32.totalorder %s590_s27, %s390_s3  ;;  %p392_p2 = pneg %p596_p0 }
  0x18   : > { %s395_s12 = scalar_lea.hbm %s741_s0, 256  ;;  %p396_p4 = scmp.lt.u32.totalorder %s590_s27, %s741_s0 }
  0x19   : > { %p393_p3 = pnand %p392_p2, %p391_p1  ;;  %p397_p6 = scmp.lt.u32.totalorder %s395_s12, %s390_s3 }
  0x1a   : > { %p399_p10 = scmp.lt.u32.totalorder %s390_s3, %s590_s27 }
  0x1b   : > { %p394_p5 = pneg %p393_p3  ;;  %p398_p7 = por %p397_p6, %p396_p4 }
  0x1d   : > { %p400_p13 = por %p399_p10, %p398_p7 }
  0x1f   : > { %p401_p12 = pnand %p400_p13, %p394_p5 }
  0x21   : > { %404 = shalt.err (!%p401_p12)
}
  0x22   : > { %s405_s16 = scalar_lea.vmem %s592_s29, 128  ;;  %s504_s17 = smov [#allocation2]  }
  0x23   : > { %p406_p1 = scmp.ne.s32.totalorder %s592_s29, %s405_s16  ;;  %s410_s22 = sshll.u32 %s504_s17, 4  ;;  %s411_s22 = int_to_ptr.vmem [resolvable:$false] %s410_s22 }
  0x24   : > { %s412_s23 = scalar_lea.vmem %s411_s22, 256  ;;  %p413_p9 = scmp.lt.s32.totalorder %s592_s29, %s411_s22 }
  0x25   : > { %p408_p3 = pnand %p406_p1, %p392_p2  ;;  %p414_p4 = scmp.lt.s32.totalorder %s412_s23, %s405_s16 }
  0x27   : > { %p409_p11 = pneg %p408_p3  ;;  %p415_p6 = por %p414_p4, %p413_p9 }
  0x29   : > { %p416_p7 = pnand %p415_p6, %p409_p11 }
  0x2b   : > { %419 = shalt.err (!%p416_p7)
}
  0x2c   : > { %s505_s24 = smov 128   ;;  %s506_s25 = smov 64  }
  0x2d   : > { %s507_s26 = smov 4   ;;  %p316_p12 = scmp.ge.s32.totalorder %s502_s11, 1 }
  0x2e   : > { %330 = dma.hbm_to_vmem [thread:$0]  (!%p596_p0), %s590_s27, 128, %s592_s29, %s600_s2, %s505_s24, %s506_s25, %s507_s26  }
  0x2f   : > { %p124_p2 = scmp.lt.s32.totalorder %s502_s11, 3 }
  0x31   : > { %p125_p5 = pnand %p316_p12, %p124_p2 }
  0x32   : > { %s631_s28 = sand.u32 (!%p125_p5), 1, %s486_s7  }
  0x33   : > { %128 = sbr.rel (%p125_p5) target bundleno = 99 (0x63), region = 24  ;;  %s317_s3 = sshll.u32 (!%p125_p5), %s631_s28, 3 }
  0x34   : > { %s131_s4 = scalar_lea.sflag (!%p125_p5), [#allocation3], %s631_s28  ;;  %s635_s5 = scalar_lea.vmem (!%p125_p5), [#allocation2], %s317_s3 }
  0x3a   : > { %473 = dma.done.wait (%p568_p8), %s131_s4, 128  }
  0x3b   : > { %475 = vsyncadd (%p568_p8), %s131_s4, 4294967168  ;;  %v154_v0 = vld [vmem:[%s635_s5] sm:$0x1]  ;;  %v155_v1 = vld [vmem:[%s635_s5 + $0x4] sm:$0x1]  ;;  %vm508_vm4 = vmmov 1  }
  0x3c   : > { %v156_v2 = vld [vmem:[%s635_s5 + $0x1] sm:$0x1]  ;;  %v157_v3 = vld [vmem:[%s635_s5 + $0x5] sm:$0x1]  ;;  %vm162_vm1 = vcmp.ne.f32.partialorder %v154_v0, %v154_v0  ;;  %vm163_vm2 = vcmp.ne.f32.partialorder %v155_v1, %v155_v1  ;;  %v174_v4 = vld [vmem:[%s635_s5 + $0x2] sm:$0x1] }
  0x3d   : > { %vm160_vm0 = vcmp.ne.f32.partialorder %v156_v2, %v156_v2  ;;  %vm161_vm3 = vcmp.ne.f32.partialorder %v157_v3, %v157_v3  ;;  %vm164_vm5 = vmxor %vm162_vm1, %vm508_vm4  ;;  %vm158_vm6 = vcmp.gt.f32.partialorder %v156_v2, %v154_v0  ;;  %vm159_vm8 = vcmp.gt.f32.partialorder %v157_v3, %v155_v1  ;;  %v175_v6 = vld [vmem:[%s635_s5 + $0x6] sm:$0x1]  ;;  %v192_v10 = vld [vmem:[%s635_s5 + $0x3] sm:$0x1]  ;;  %s318_s18 = sshll.u32 %s631_s28, 1  ;;  %s320_s30 = sshll.u32 %s494_s9, 5 }
  0x3e   : > { %vm165_vm7 = vmxor %vm163_vm2, %vm508_vm4  ;;  %vm178_vm13 = vcmp.ne.f32.partialorder %v174_v4, %v174_v4  ;;  %vm179_vm15 = vcmp.ne.f32.partialorder %v175_v6, %v175_v6  ;;  %v193_v12 = vld [vmem:[%s635_s5 + $0x7] sm:$0x1]  ;;  %v509_v16 = vmov 0   ;;  %s152_s27 = scalar_lea.vmem [#allocation5], %s318_s18  ;;  %s694_s13 = scalar_lea.hbm %s742_s1, %s320_s30 }
  0x3f   : > { %vm166_vm9 = vmand %vm160_vm0, %vm164_vm5  ;;  %s228_s29 = sshll.u32 %s152_s27, 4  ;;  %s213_s15 = scalar_lea.sflag [#allocation4], %s631_s28  ;;  %s689_s29 = int_to_ptr.vmem [resolvable:$true] %s228_s29 }
  0x40   : > { %vm167_vm10 = vmand %vm161_vm3, %vm165_vm7  ;;  %s420_s16 = scalar_lea.vmem %s689_s29, 32  ;;  %p757_p9 = scmp.ne.s32.totalorder %s746_s19, 0 }
  0x41   : > { %vm648_vm11 = vmor %vm158_vm6, %vm166_vm9  ;;  %p421_p8 = scmp.ne.s32.totalorder %s689_s29, %s420_s16  ;;  %s510_s9 = smov [#allocation5]  }
  0x42   : > { %vm653_vm12 = vmor %vm159_vm8, %vm167_vm10  ;;  %v170_v8 = vsel %vm648_vm11, %v156_v2, %v154_v0  ;;  %vm196_vm10 = vcmp.ne.f32.partialorder %v192_v10, %v192_v10  ;;  %v172_v17 = vsel %vm648_vm11, 1, %v509_v16  ;;  %s424_s17 = sshll.u32 %s510_s9, 4  ;;  %s425_s17 = int_to_ptr.vmem [resolvable:$false] %s424_s17 }
  0x43   : > { %v171_v9 = vsel %vm653_vm12, %v157_v3, %v155_v1  ;;  %vm180_vm14 = vcmp.ne.f32.partialorder %v170_v8, %v170_v8  ;;  %vm176_vm2 = vcmp.gt.f32.partialorder %v174_v4, %v170_v8  ;;  %v173_v18 = vsel %vm653_vm12, 1, %v509_v16  ;;  %p422_p11 = pnand %p421_p8, %p757_p9  ;;  %s426_s22 = scalar_lea.vmem %s425_s17, 64 }
  0x44   : > { %vm181_vm0 = vcmp.ne.f32.partialorder %v171_v9, %v171_v9  ;;  %vm182_vm1 = vmxor %vm180_vm14, %vm508_vm4  ;;  %vm177_vm5 = vcmp.gt.f32.partialorder %v175_v6, %v171_v9  ;;  %vm197_vm14 = vcmp.ne.f32.partialorder %v193_v12, %v193_v12  ;;  %p427_p10 = scmp.lt.s32.totalorder %s689_s29, %s425_s17  ;;  %p428_p13 = scmp.lt.s32.totalorder %s426_s22, %s420_s16 }
  0x45   : > { %vm183_vm3 = vmxor %vm181_vm0, %vm508_vm4  ;;  %p423_p0 = pneg %p422_p11 }
  0x46   : > { %vm184_vm6 = vmand %vm178_vm13, %vm182_vm1  ;;  %p429_p1 = por %p428_p13, %p427_p10 }
  0x47   : > { %vm185_vm7 = vmand %vm179_vm15, %vm183_vm3 }
  0x48   : > { %vm664_vm8 = vmor %vm176_vm2, %vm184_vm6  ;;  %p430_p3 = pnand %p429_p1, %p423_p0 }
  0x49   : > { %vm669_vm9 = vmor %vm177_vm5, %vm185_vm7  ;;  %v188_v14 = vsel %vm664_vm8, %v174_v4, %v170_v8  ;;  %v190_v19 = vsel %vm664_vm8, 2, %v172_v17  ;;  %vm209_vm7 = vcmask 1041409  }
  0x4a   : > { %v189_v15 = vsel %vm669_vm9, %v175_v6, %v171_v9  ;;  %vm198_vm13 = vcmp.ne.f32.partialorder %v188_v14, %v188_v14  ;;  %vm194_vm1 = vcmp.gt.f32.partialorder %v192_v10, %v188_v14  ;;  %v191_v20 = vsel %vm669_vm9, 2, %v173_v18 }
  0x4b   : > { %vm199_vm15 = vcmp.ne.f32.partialorder %v189_v15, %v189_v15  ;;  %vm200_vm0 = vmxor %vm198_vm13, %vm508_vm4  ;;  %vm195_vm3 = vcmp.gt.f32.partialorder %v193_v12, %v189_v15 }
  0x4c   : > { %vm201_vm2 = vmxor %vm199_vm15, %vm508_vm4 }
  0x4d   : > { %vm202_vm5 = vmand %vm196_vm10, %vm200_vm0 }
  0x4e   : > { %vm203_vm11 = vmand %vm197_vm14, %vm201_vm2 }
  0x4f   : > { %vm204_vm6 = vmor %vm194_vm1, %vm202_vm5 }
  0x50   : > { %vm205_vm12 = vmor %vm195_vm3, %vm203_vm11  ;;  %v206_v21 = vsel %vm204_vm6, 3, %v190_v19 }
  0x51   : > { %v207_v22 = vsel %vm205_vm12, 3, %v191_v20 }
  0x52   : > { %v208_v23 = vrot.slane %v207_v22, 7 }
  0x54   : > { %v210_v24 = vsel %vm209_vm7, %v208_v23, %v206_v21 }
  0x55   : > { %211 = vst [vmem:[%s152_s27] sm:$0x3] %v210_v24 }
  0x56   : > { %433 = shalt.err (!%p430_p3)
}
  0x57   : > { %s434_s23 = scalar_lea.hbm %s694_s13, 32  ;;  %s438_s26 = scalar_lea.hbm %s742_s1, 64 }
  0x58   : > { %p435_p4 = scmp.ne.s32.totalorder %s694_s13, %s434_s23  ;;  %p439_p12 = scmp.lt.u32.totalorder %s694_s13, %s742_s1 }
  0x59   : > { %p440_p2 = scmp.lt.u32.totalorder %s438_s26, %s434_s23  ;;  %p442_p8 = scmp.lt.u32.totalorder %s434_s23, %s694_s13 }
  0x5a   : > { %p436_p6 = pnand %p435_p4, %p757_p9 }
  0x5b   : > { %p441_p5 = por %p440_p2, %p439_p12 }
  0x5c   : > { %p437_p7 = pneg %p436_p6 }
  0x5d   : > { %p443_p11 = por %p442_p8, %p441_p5 }
  0x5f   : > { %p444_p0 = pnand %p443_p11, %p437_p7 }
  0x61   : > { %447 = shalt.err (!%p444_p0)
}
  0x62   : > { %325 = dma.vmem_to_hbm [thread:$0]  (%p757_p9), %s689_s29, 32, %s694_s13, %s213_s15  }
  0x63 PF: > { %s240_s4 = sand.u32 1, %s482_s6   ;;  %p758_p10 = scmp.ne.s32.totalorder %s747_s21, 0 }
  0x64   : > { %p759_p13 = scmp.ge.s32.totalorder %s502_s11, 2  ;;  %s241_s5 = scalar_lea.sflag [#allocation4], %s240_s4 }
  0x66   : > { %p332_p1 = pnand %p759_p13, %p758_p10 }
  0x68   : > { %477 = dma.done.wait (!%p332_p1), %s241_s5, 32  }
  0x69   : > { %479 = vsyncadd (!%p332_p1), %s241_s5, 4294967264  ;;  %s17_s11 = sadd.s32 1, %s502_s11   ;;  %s760_s6 = smov %s486_s7 }
  0x6a   : > { %p14_p3 = scmp.ge.s32.totalorder %s17_s11, 4   ;;  %s761_s7 = smov %s490_s8 }
  0x6b   : > { %s762_s8 = smov %s577_s20  ;;  %s763_s9 = smov %s498_s10 }
  0x6c   : > { %s764_s10 = smov %s766_s14  ;;  %16 = sbr.rel (!%p14_p3) target bundleno = 6 (0x6), region = 69 }
  0x73   :  { %246 = vsyncpa [#allocation3], 1 }
  0x74   :  { %248 = vsyncpa [#allocation3 + $0x1], 1 }
  0x75   :  { %249 = vsyncpa [#allocation4], 1 }
  0x76   :  { %251 = vsyncpa [#allocation4 + $0x1], 1 }

</bundles_post_ra>
